<compile_context>
chip_gen: v5e
topology: v5e:2x2
jax: 0.10.0
libtpu: 0.0.40
codegen_flags: <defaults>
</compile_context>

<pallas_src>
import functools
import math

import jax
import jax.numpy as jnp
from jax.experimental import pallas as pl
from jax.experimental.pallas import tpu as pltpu


def mha_kernel(*refs, n_heads, head_dim, compute_dtype, return_attn, has_mask):
    it = iter(refs)
    q_ref = next(it)
    k_ref = next(it)
    v_ref = next(it)
    mask_ref = next(it) if has_mask else None
    wq_ref = next(it); bq_ref = next(it)
    wk_ref = next(it); bk_ref = next(it)
    wv_ref = next(it); bv_ref = next(it)
    wo_ref = next(it); bo_ref = next(it)
    out_ref = next(it)
    attn_ref = next(it) if return_attn else None
    ctx_ref = next(it)          # VMEM scratch (Sq, E) f32

    cd = compute_dtype

    q = q_ref[0].astype(cd)     # (Sq, E)
    k = k_ref[0].astype(cd)     # (Sk, E)
    v = v_ref[0].astype(cd)     # (Sk, E)

    # Full-width projections on the MXU, f32 accumulation.  The 1/sqrt(embSize)
    # scale is already folded into wq/bq by the wrapper.  Biases are read once.
    Q = jnp.dot(q, wq_ref[...], preferred_element_type=jnp.float32) + bq_ref[...]
    K = jnp.dot(k, wk_ref[...], preferred_element_type=jnp.float32) + bk_ref[...]
    V = jnp.dot(v, wv_ref[...], preferred_element_type=jnp.float32) + bv_ref[...]

    # Split heads: (S, E) -> (H, S, hd).  Pure relayout done once per tensor;
    # every matmul below is head-batched (no per-head matmul loop).
    def split_heads(x):
        return jnp.stack(
            [x[:, h * head_dim:(h + 1) * head_dim] for h in range(n_heads)],
            axis=0).astype(cd)

    Qh = split_heads(Q)   # (H, Sq, hd)
    Kh = split_heads(K)   # (H, Sk, hd)
    Vh = split_heads(V)   # (H, Sk, hd)

    # Head-batched QK^T: contraction over hd, batch over heads.  dot_general
    # consumes the transposed operand directly (no XLU transpose of K).
    s = jnp.einsum('hqd,hkd->hqk', Qh, Kh,
                   preferred_element_type=jnp.float32)       # (H, Sq, Sk) f32

    if mask_ref is not None:
        # masked_fill(mask == 0, -inf), broadcast (Sq, Sk) mask over heads.
        s = jnp.where(mask_ref[0] == 0.0, jnp.float32(-jnp.inf), s)

    # Numerically-stable softmax; normalisation via approximate reciprocal
    # (EUP slot, nearly free) instead of a VALU divide over the (H,Sq,Sk) tile.
    m = jnp.max(s, axis=-1, keepdims=True)
    e = jnp.exp(s - m)
    attn = e * pl.reciprocal(jnp.sum(e, axis=-1, keepdims=True), approx=True)

    if attn_ref is not None:
        attn_ref[0] = attn.astype(attn_ref.dtype)   # single (H, Sq, Sk) store

    # Head-batched attn @ V -> (H, Sq, hd), f32 accumulation.
    ctx_h = jnp.einsum('hqk,hkd->hqd', attn.astype(cd), Vh,
                       preferred_element_type=jnp.float32)

    # Merge heads through the resident VMEM scratch (no concatenate on the
    # critical path), then a single full-width output projection.
    for h in range(n_heads):
        ctx_ref[:, h * head_dim:(h + 1) * head_dim] = ctx_h[h]

    out = jnp.dot(ctx_ref[...].astype(cd), wo_ref[...],
                  preferred_element_type=jnp.float32) + bo_ref[...]
    out_ref[0] = out.astype(out_ref.dtype)


def multi_head_attention(query, key, value, params, *, n_heads, mask=None,
                         return_attn=True, compute_dtype=jnp.float32):
    """query: (B, Sq, E); key/value: (B, Sk, E) float32.

    params holds pre-transposed Linear weights (y = x @ W + b):
      wq/wk/wv/wo: (E, E), bq/bk/bv/bo: (1, E).
    mask: optional (B, Sq, Sk); positions where mask == 0 are filled with -inf
      before softmax (broadcast over heads), mirroring the module.
    Returns (out, attn) if return_attn else out (skips the O(S^2) HBM write).
    compute_dtype=jnp.bfloat16 narrows MXU operands on v6e/v7x (f32 accumulate).
    """
    B, Sq, E = query.shape
    Sk = key.shape[1]
    assert value.shape[1] == Sk and key.shape[-1] == E and value.shape[-1] == E
    assert E % n_heads == 0
    head_dim = E // n_heads

    # Fold 1/sqrt(embSize) into the Q projection: O(E^2) once here instead of
    # O(H*S^2) per batch in the kernel.  (Module uses sqrt(embSize), not hd.)
    inv_scale = 1.0 / math.sqrt(float(E))
    wq = (params["wq"] * inv_scale).astype(compute_dtype)
    bq = params["bq"] * inv_scale
    wk = params["wk"].astype(compute_dtype)
    wv = params["wv"].astype(compute_dtype)
    wo = params["wo"].astype(compute_dtype)
    bk, bv, bo = params["bk"], params["bv"], params["bo"]

    has_mask = mask is not None

    kernel = functools.partial(mha_kernel, n_heads=n_heads, head_dim=head_dim,
                               compute_dtype=compute_dtype,
                               return_attn=return_attn, has_mask=has_mask)

    q_spec = pl.BlockSpec((1, Sq, E), lambda b: (b, 0, 0))
    kv_spec = pl.BlockSpec((1, Sk, E), lambda b: (b, 0, 0))
    # Constant index_map -> weight blocks stay resident across grid steps.
    w_spec = pl.BlockSpec((E, E), lambda b: (0, 0))
    b_spec = pl.BlockSpec((1, E), lambda b: (0, 0))

    in_specs = [q_spec, kv_spec, kv_spec]
    inputs = [query, key, value]
    if has_mask:
        mask_f = jnp.asarray(mask, jnp.float32)
        assert mask_f.shape == (B, Sq, Sk)
        in_specs.append(pl.BlockSpec((1, Sq, Sk), lambda b: (b, 0, 0)))
        inputs.append(mask_f)
    in_specs += [w_spec, b_spec, w_spec, b_spec, w_spec, b_spec, w_spec, b_spec]
    inputs += [wq, bq, wk, bk, wv, bv, wo, bo]

    out_sd = jax.ShapeDtypeStruct((B, Sq, E), jnp.float32)
    out_spec = pl.BlockSpec((1, Sq, E), lambda b: (b, 0, 0))

    if return_attn:
        out_shape = (out_sd,
                     jax.ShapeDtypeStruct((B, n_heads, Sq, Sk), jnp.float32))
        out_specs = [out_spec,
                     pl.BlockSpec((1, n_heads, Sq, Sk), lambda b: (b, 0, 0, 0))]
    else:
        out_shape = out_sd
        out_specs = out_spec

    return pl.pallas_call(
        kernel,
        out_shape=out_shape,
        grid_spec=pltpu.PrefetchScalarGridSpec(
            num_scalar_prefetch=0,
            grid=(B,),
            in_specs=in_specs,
            out_specs=out_specs,
            scratch_shapes=[pltpu.VMEM((Sq, E), jnp.float32)]),
        # "parallel" lets v7x shard the batch axis across its 2 TensorCores;
        # no-op on v5e/v6e.
        compiler_params=pltpu.CompilerParams(
            dimension_semantics=("parallel",)),
    )(*inputs)


def init_params(key, emb_size):
    """Deterministic PyTorch-Linear-style init (uniform +-1/sqrt(fan_in)).
    Weights are stored pre-transposed: y = x @ W + b."""
    bound = 1.0 / math.sqrt(emb_size)
    names = ["wq", "bq", "wk", "bk", "wv", "bv", "wo", "bo"]
    keys = jax.random.split(key, len(names))
    params = {}
    for i, name in enumerate(names):
        shape = (emb_size, emb_size) if name.startswith("w") else (1, emb_size)
        params[name] = jax.random.uniform(keys[i], shape, jnp.float32,
                                          minval=-bound, maxval=bound)
    return params


def reference(query, key, value, params, *, n_heads, mask=None):
    """Pure-JAX reference mirroring the PyTorch forward."""
    B, Sq, E = query.shape
    Sk = key.shape[1]
    hd = E // n_heads
    Q = query @ params["wq"] + params["bq"]
    K = key @ params["wk"] + params["bk"]
    V = value @ params["wv"] + params["bv"]
    Q = Q.reshape(B, Sq, n_heads, hd).transpose(0, 2, 1, 3)
    K = K.reshape(B, Sk, n_heads, hd).transpose(0, 2, 1, 3)
    V = V.reshape(B, Sk, n_heads, hd).transpose(0, 2, 1, 3)
    scores = jnp.einsum("bhqd,bhkd->bhqk", Q, K) / jnp.sqrt(jnp.float32(E))
    if mask is not None:
        scores = jnp.where(mask[:, None, :, :] == 0, -jnp.inf, scores)
    attn = jax.nn.softmax(scores, axis=-1)
    out = jnp.einsum("bhqk,bhkd->bhqd", attn, V)
    out = out.transpose(0, 2, 1, 3).reshape(B, Sq, E)
    out = out @ params["wo"] + params["bo"]
    return out, attn


if __name__ == "__main__":
    B, S, E, H = 2, 8, 32, 4

    root = jax.random.PRNGKey(0)
    kq, kk, kv, kp = jax.random.split(root, 4)
    query = jax.random.normal(kq, (B, S, E), jnp.float32)
    key_in = jax.random.normal(kk, (B, S, E), jnp.float32)
    value = jax.random.normal(kv, (B, S, E), jnp.float32)
    params = init_params(kp, E)

    # 1) f32 path, no mask, attention weights returned (module's (out, attn)).
    ref_out, ref_attn = reference(query, key_in, value, params, n_heads=H)
    out, attn = multi_head_attention(query, key_in, value, params, n_heads=H)
    jax.block_until_ready((out, attn))
    assert out.shape == (B, S, E) and attn.shape == (B, H, S, S)
    # Tolerance loosened slightly vs exact f32 because of the approx reciprocal.
    assert jnp.allclose(out, ref_out, atol=5e-3, rtol=5e-3)
    assert jnp.allclose(attn, ref_attn, atol=5e-3, rtol=5e-3)

    # 2) masked path (causal mask, masked_fill with -inf like the module).
    causal = jnp.tril(jnp.ones((S, S), jnp.float32))
    mask = jnp.broadcast_to(causal, (B, S, S))
    ref_out_m, ref_attn_m = reference(query, key_in, value, params,
                                      n_heads=H, mask=mask)
    out_m, attn_m = multi_head_attention(query, key_in, value, params,
                                         n_heads=H, mask=mask)
    jax.block_until_ready((out_m, attn_m))
    assert jnp.allclose(out_m, ref_out_m, atol=5e-3, rtol=5e-3)
    assert jnp.allclose(attn_m, ref_attn_m, atol=5e-3, rtol=5e-3)

    # 3) bf16-MXU-operand fast path (v6e/v7x), attention output skipped.
    out_b = multi_head_attention(query, key_in, value, params, n_heads=H,
                                 return_attn=False, compute_dtype=jnp.bfloat16)
    jax.block_until_ready(out_b)
    assert out_b.shape == (B, S, E)
    assert jnp.allclose(out_b, ref_out, atol=5e-2, rtol=5e-2)

    print("KERNEL_OK")
</pallas_src>

<mosaic_0001>
module attributes {stable_mosaic.version = 11 : i64} {
  func.func @mha_kernel(%arg0: i32, %arg1: memref<1x8x32xf32, #tpu.memory_space<vmem>>, %arg2: memref<1x8x32xf32, #tpu.memory_space<vmem>>, %arg3: memref<1x8x32xf32, #tpu.memory_space<vmem>>, %arg4: memref<32x32xf32, #tpu.memory_space<vmem>>, %arg5: memref<1x32xf32, #tpu.memory_space<vmem>>, %arg6: memref<32x32xf32, #tpu.memory_space<vmem>>, %arg7: memref<1x32xf32, #tpu.memory_space<vmem>>, %arg8: memref<32x32xf32, #tpu.memory_space<vmem>>, %arg9: memref<1x32xf32, #tpu.memory_space<vmem>>, %arg10: memref<32x32xf32, #tpu.memory_space<vmem>>, %arg11: memref<1x32xf32, #tpu.memory_space<vmem>>, %arg12: memref<1x8x32xf32, #tpu.memory_space<vmem>>, %arg13: memref<1x4x8x8xf32, #tpu.memory_space<vmem>>, %arg14: memref<8x32xf32, #tpu.memory_space<vmem>>) attributes {dimension_semantics = [#tpu.dimension_semantics<parallel>], iteration_bounds = array<i64: 2>, scalar_prefetch = 0 : i64, scratch_operands = 1 : i64, tpu.core_type = #tpu.core_type<tc>, window_params = [{transform_indices = @transform_0, window_bounds = array<i64: 1, 8, 32>}, {transform_indices = @transform_1, window_bounds = array<i64: 1, 8, 32>}, {transform_indices = @transform_2, window_bounds = array<i64: 1, 8, 32>}, {pipeline_mode = #tpu.pipeline_mode<synchronous>, transform_indices = @transform_3, window_bounds = array<i64: 32, 32>}, {pipeline_mode = #tpu.pipeline_mode<synchronous>, transform_indices = @transform_4, window_bounds = array<i64: 1, 32>}, {pipeline_mode = #tpu.pipeline_mode<synchronous>, transform_indices = @transform_5, window_bounds = array<i64: 32, 32>}, {pipeline_mode = #tpu.pipeline_mode<synchronous>, transform_indices = @transform_6, window_bounds = array<i64: 1, 32>}, {pipeline_mode = #tpu.pipeline_mode<synchronous>, transform_indices = @transform_7, window_bounds = array<i64: 32, 32>}, {pipeline_mode = #tpu.pipeline_mode<synchronous>, transform_indices = @transform_8, window_bounds = array<i64: 1, 32>}, {pipeline_mode = #tpu.pipeline_mode<synchronous>, transform_indices = @transform_9, window_bounds = array<i64: 32, 32>}, {pipeline_mode = #tpu.pipeline_mode<synchronous>, transform_indices = @transform_10, window_bounds = array<i64: 1, 32>}, {transform_indices = @transform_11, window_bounds = array<i64: 1, 8, 32>}, {transform_indices = @transform_12, window_bounds = array<i64: 1, 4, 8, 8>}]} {
    %c0 = arith.constant 0 : index
    %c0_0 = arith.constant 0 : index
    %c0_1 = arith.constant 0 : index
    %0 = vector.load %arg1[%c0, %c0_0, %c0_1] : memref<1x8x32xf32, #tpu.memory_space<vmem>>, vector<1x8x32xf32>
    %1 = vector.shape_cast %0 : vector<1x8x32xf32> to vector<8x32xf32>
    %c0_2 = arith.constant 0 : index
    %c0_3 = arith.constant 0 : index
    %c0_4 = arith.constant 0 : index
    %2 = vector.load %arg2[%c0_2, %c0_3, %c0_4] : memref<1x8x32xf32, #tpu.memory_space<vmem>>, vector<1x8x32xf32>
    %3 = vector.shape_cast %2 : vector<1x8x32xf32> to vector<8x32xf32>
    %c0_5 = arith.constant 0 : index
    %c0_6 = arith.constant 0 : index
    %c0_7 = arith.constant 0 : index
    %4 = vector.load %arg3[%c0_5, %c0_6, %c0_7] : memref<1x8x32xf32, #tpu.memory_space<vmem>>, vector<1x8x32xf32>
    %5 = vector.shape_cast %4 : vector<1x8x32xf32> to vector<8x32xf32>
    %c0_8 = arith.constant 0 : index
    %c0_9 = arith.constant 0 : index
    %6 = vector.load %arg4[%c0_8, %c0_9] : memref<32x32xf32, #tpu.memory_space<vmem>>, vector<32x32xf32>
    %cst = arith.constant dense<0.000000e+00> : vector<8x32xf32>
    %7 = tpu.matmul %1, %6, %cst {dimension_numbers = #tpu.dot_dimension_numbers<[1], [0], [0], [1], [0, 0, 1, 1], [], []>} : vector<8x32xf32>, vector<32x32xf32>, vector<8x32xf32> -> vector<8x32xf32>
    %c0_10 = arith.constant 0 : index
    %c0_11 = arith.constant 0 : index
    %8 = vector.load %arg5[%c0_10, %c0_11] : memref<1x32xf32, #tpu.memory_space<vmem>>, vector<1x32xf32>
    %9 = vector.broadcast %8 : vector<1x32xf32> to vector<8x32xf32>
    %10 = arith.addf %7, %9 : vector<8x32xf32>
    %c0_12 = arith.constant 0 : index
    %c0_13 = arith.constant 0 : index
    %11 = vector.load %arg6[%c0_12, %c0_13] : memref<32x32xf32, #tpu.memory_space<vmem>>, vector<32x32xf32>
    %cst_14 = arith.constant dense<0.000000e+00> : vector<8x32xf32>
    %12 = tpu.matmul %3, %11, %cst_14 {dimension_numbers = #tpu.dot_dimension_numbers<[1], [0], [0], [1], [0, 0, 1, 1], [], []>} : vector<8x32xf32>, vector<32x32xf32>, vector<8x32xf32> -> vector<8x32xf32>
    %c0_15 = arith.constant 0 : index
    %c0_16 = arith.constant 0 : index
    %13 = vector.load %arg7[%c0_15, %c0_16] : memref<1x32xf32, #tpu.memory_space<vmem>>, vector<1x32xf32>
    %14 = vector.broadcast %13 : vector<1x32xf32> to vector<8x32xf32>
    %15 = arith.addf %12, %14 : vector<8x32xf32>
    %c0_17 = arith.constant 0 : index
    %c0_18 = arith.constant 0 : index
    %16 = vector.load %arg8[%c0_17, %c0_18] : memref<32x32xf32, #tpu.memory_space<vmem>>, vector<32x32xf32>
    %cst_19 = arith.constant dense<0.000000e+00> : vector<8x32xf32>
    %17 = tpu.matmul %5, %16, %cst_19 {dimension_numbers = #tpu.dot_dimension_numbers<[1], [0], [0], [1], [0, 0, 1, 1], [], []>} : vector<8x32xf32>, vector<32x32xf32>, vector<8x32xf32> -> vector<8x32xf32>
    %c0_20 = arith.constant 0 : index
    %c0_21 = arith.constant 0 : index
    %18 = vector.load %arg9[%c0_20, %c0_21] : memref<1x32xf32, #tpu.memory_space<vmem>>, vector<1x32xf32>
    %19 = vector.broadcast %18 : vector<1x32xf32> to vector<8x32xf32>
    %20 = arith.addf %17, %19 : vector<8x32xf32>
    %21 = vector.extract_strided_slice %10 {offsets = [0, 0], sizes = [8, 8], strides = [1, 1]} : vector<8x32xf32> to vector<8x8xf32>
    %22 = vector.extract_strided_slice %10 {offsets = [0, 8], sizes = [8, 8], strides = [1, 1]} : vector<8x32xf32> to vector<8x8xf32>
    %23 = vector.extract_strided_slice %10 {offsets = [0, 16], sizes = [8, 8], strides = [1, 1]} : vector<8x32xf32> to vector<8x8xf32>
    %24 = vector.extract_strided_slice %10 {offsets = [0, 24], sizes = [8, 8], strides = [1, 1]} : vector<8x32xf32> to vector<8x8xf32>
    %25 = vector.shape_cast %21 : vector<8x8xf32> to vector<1x8x8xf32>
    %26 = vector.shape_cast %22 : vector<8x8xf32> to vector<1x8x8xf32>
    %27 = vector.shape_cast %23 : vector<8x8xf32> to vector<1x8x8xf32>
    %28 = vector.shape_cast %24 : vector<8x8xf32> to vector<1x8x8xf32>
    %29 = tpu.concatenate %25, %26, %27, %28 in 0 : vector<1x8x8xf32>, vector<1x8x8xf32>, vector<1x8x8xf32>, vector<1x8x8xf32> -> vector<4x8x8xf32>
    %30 = vector.extract_strided_slice %15 {offsets = [0, 0], sizes = [8, 8], strides = [1, 1]} : vector<8x32xf32> to vector<8x8xf32>
    %31 = vector.extract_strided_slice %15 {offsets = [0, 8], sizes = [8, 8], strides = [1, 1]} : vector<8x32xf32> to vector<8x8xf32>
    %32 = vector.extract_strided_slice %15 {offsets = [0, 16], sizes = [8, 8], strides = [1, 1]} : vector<8x32xf32> to vector<8x8xf32>
    %33 = vector.extract_strided_slice %15 {offsets = [0, 24], sizes = [8, 8], strides = [1, 1]} : vector<8x32xf32> to vector<8x8xf32>
    %34 = vector.shape_cast %30 : vector<8x8xf32> to vector<1x8x8xf32>
    %35 = vector.shape_cast %31 : vector<8x8xf32> to vector<1x8x8xf32>
    %36 = vector.shape_cast %32 : vector<8x8xf32> to vector<1x8x8xf32>
    %37 = vector.shape_cast %33 : vector<8x8xf32> to vector<1x8x8xf32>
    %38 = tpu.concatenate %34, %35, %36, %37 in 0 : vector<1x8x8xf32>, vector<1x8x8xf32>, vector<1x8x8xf32>, vector<1x8x8xf32> -> vector<4x8x8xf32>
    %39 = vector.extract_strided_slice %20 {offsets = [0, 0], sizes = [8, 8], strides = [1, 1]} : vector<8x32xf32> to vector<8x8xf32>
    %40 = vector.extract_strided_slice %20 {offsets = [0, 8], sizes = [8, 8], strides = [1, 1]} : vector<8x32xf32> to vector<8x8xf32>
    %41 = vector.extract_strided_slice %20 {offsets = [0, 16], sizes = [8, 8], strides = [1, 1]} : vector<8x32xf32> to vector<8x8xf32>
    %42 = vector.extract_strided_slice %20 {offsets = [0, 24], sizes = [8, 8], strides = [1, 1]} : vector<8x32xf32> to vector<8x8xf32>
    %43 = vector.shape_cast %39 : vector<8x8xf32> to vector<1x8x8xf32>
    %44 = vector.shape_cast %40 : vector<8x8xf32> to vector<1x8x8xf32>
    %45 = vector.shape_cast %41 : vector<8x8xf32> to vector<1x8x8xf32>
    %46 = vector.shape_cast %42 : vector<8x8xf32> to vector<1x8x8xf32>
    %47 = tpu.concatenate %43, %44, %45, %46 in 0 : vector<1x8x8xf32>, vector<1x8x8xf32>, vector<1x8x8xf32>, vector<1x8x8xf32> -> vector<4x8x8xf32>
    "tpu.trace_start"() <{level = 10 : i32, message = "hqd,hkd->hqk"}> : () -> ()
    %cst_22 = arith.constant dense<0.000000e+00> : vector<4x8x8xf32>
    %48 = tpu.matmul %29, %38, %cst_22 {dimension_numbers = #tpu.dot_dimension_numbers<[2], [2], [1], [1], [0, 0, 0, 1, 1, 1], [0], [0]>} : vector<4x8x8xf32>, vector<4x8x8xf32>, vector<4x8x8xf32> -> vector<4x8x8xf32>
    "tpu.trace_stop"() : () -> ()
    %cst_23 = arith.constant dense<0xFF800000> : vector<4x8xf32>
    %49 = vector.multi_reduction <maximumf>, %48, %cst_23 [2] : vector<4x8x8xf32> to vector<4x8xf32>
    %50 = vector.shape_cast %49 : vector<4x8xf32> to vector<4x8x1xf32>
    %51 = vector.broadcast %50 : vector<4x8x1xf32> to vector<4x8x8xf32>
    %52 = arith.subf %48, %51 : vector<4x8x8xf32>
    %53 = math.exp %52 : vector<4x8x8xf32>
    %cst_24 = arith.constant dense<0.000000e+00> : vector<4x8xf32>
    %54 = vector.multi_reduction <add>, %53, %cst_24 [2] : vector<4x8x8xf32> to vector<4x8xf32>
    %55 = vector.shape_cast %54 : vector<4x8xf32> to vector<4x8x1xf32>
    %56 = tpu.reciprocal %55 {approx = true} : vector<4x8x1xf32> -> vector<4x8x1xf32>
    %57 = vector.broadcast %56 : vector<4x8x1xf32> to vector<4x8x8xf32>
    %58 = arith.mulf %53, %57 : vector<4x8x8xf32>
    %c0_25 = arith.constant 0 : index
    %c0_26 = arith.constant 0 : index
    %c0_27 = arith.constant 0 : index
    %c0_28 = arith.constant 0 : index
    %59 = vector.load %arg13[%c0_25, %c0_26, %c0_27, %c0_28] : memref<1x4x8x8xf32, #tpu.memory_space<vmem>>, vector<1x4x8x8xf32>
    %60 = vector.shape_cast %59 : vector<1x4x8x8xf32> to vector<4x8x8xf32>
    %61 = vector.shape_cast %58 : vector<4x8x8xf32> to vector<1x4x8x8xf32>
    tpu.vector_store %arg13[%c0_25, %c0_26, %c0_27, %c0_28], %61 {strides = array<i32>} : memref<1x4x8x8xf32, #tpu.memory_space<vmem>>, vector<1x4x8x8xf32>,
    "tpu.trace_start"() <{level = 10 : i32, message = "hqk,hkd->hqd"}> : () -> ()
    %cst_29 = arith.constant dense<0.000000e+00> : vector<4x8x8xf32>
    %62 = tpu.matmul %58, %47, %cst_29 {dimension_numbers = #tpu.dot_dimension_numbers<[2], [1], [1], [2], [0, 0, 0, 1, 1, 2], [0], [0]>} : vector<4x8x8xf32>, vector<4x8x8xf32>, vector<4x8x8xf32> -> vector<4x8x8xf32>
    "tpu.trace_stop"() : () -> ()
    %63 = vector.extract_strided_slice %62 {offsets = [0, 0, 0], sizes = [1, 8, 8], strides = [1, 1, 1]} : vector<4x8x8xf32> to vector<1x8x8xf32>
    %64 = vector.shape_cast %63 : vector<1x8x8xf32> to vector<8x8xf32>
    %c0_30 = arith.constant 0 : index
    %c0_31 = arith.constant 0 : index
    %65 = vector.load %arg14[%c0_30, %c0_31] : memref<8x32xf32, #tpu.memory_space<vmem>>, vector<8x8xf32>
    tpu.vector_store %arg14[%c0_30, %c0_31], %64 {strides = array<i32>} : memref<8x32xf32, #tpu.memory_space<vmem>>, vector<8x8xf32>,
    %66 = vector.extract_strided_slice %62 {offsets = [1, 0, 0], sizes = [1, 8, 8], strides = [1, 1, 1]} : vector<4x8x8xf32> to vector<1x8x8xf32>
    %67 = vector.shape_cast %66 : vector<1x8x8xf32> to vector<8x8xf32>
    %c0_32 = arith.constant 0 : index
    %c8 = arith.constant 8 : index
    %68 = vector.load %arg14[%c0_32, %c8] : memref<8x32xf32, #tpu.memory_space<vmem>>, vector<8x8xf32>
    tpu.vector_store %arg14[%c0_32, %c8], %67 {strides = array<i32>} : memref<8x32xf32, #tpu.memory_space<vmem>>, vector<8x8xf32>,
    %69 = vector.extract_strided_slice %62 {offsets = [2, 0, 0], sizes = [1, 8, 8], strides = [1, 1, 1]} : vector<4x8x8xf32> to vector<1x8x8xf32>
    %70 = vector.shape_cast %69 : vector<1x8x8xf32> to vector<8x8xf32>
    %c0_33 = arith.constant 0 : index
    %c16 = arith.constant 16 : index
    %71 = vector.load %arg14[%c0_33, %c16] : memref<8x32xf32, #tpu.memory_space<vmem>>, vector<8x8xf32>
    tpu.vector_store %arg14[%c0_33, %c16], %70 {strides = array<i32>} : memref<8x32xf32, #tpu.memory_space<vmem>>, vector<8x8xf32>,
    %72 = vector.extract_strided_slice %62 {offsets = [3, 0, 0], sizes = [1, 8, 8], strides = [1, 1, 1]} : vector<4x8x8xf32> to vector<1x8x8xf32>
    %73 = vector.shape_cast %72 : vector<1x8x8xf32> to vector<8x8xf32>
    %c0_34 = arith.constant 0 : index
    %c24 = arith.constant 24 : index
    %74 = vector.load %arg14[%c0_34, %c24] : memref<8x32xf32, #tpu.memory_space<vmem>>, vector<8x8xf32>
    tpu.vector_store %arg14[%c0_34, %c24], %73 {strides = array<i32>} : memref<8x32xf32, #tpu.memory_space<vmem>>, vector<8x8xf32>,
    %c0_35 = arith.constant 0 : index
    %c0_36 = arith.constant 0 : index
    %75 = vector.load %arg14[%c0_35, %c0_36] : memref<8x32xf32, #tpu.memory_space<vmem>>, vector<8x32xf32>
    %c0_37 = arith.constant 0 : index
    %c0_38 = arith.constant 0 : index
    %76 = vector.load %arg10[%c0_37, %c0_38] : memref<32x32xf32, #tpu.memory_space<vmem>>, vector<32x32xf32>
    %cst_39 = arith.constant dense<0.000000e+00> : vector<8x32xf32>
    %77 = tpu.matmul %75, %76, %cst_39 {dimension_numbers = #tpu.dot_dimension_numbers<[1], [0], [0], [1], [0, 0, 1, 1], [], []>} : vector<8x32xf32>, vector<32x32xf32>, vector<8x32xf32> -> vector<8x32xf32>
    %c0_40 = arith.constant 0 : index
    %c0_41 = arith.constant 0 : index
    %78 = vector.load %arg11[%c0_40, %c0_41] : memref<1x32xf32, #tpu.memory_space<vmem>>, vector<1x32xf32>
    %79 = vector.broadcast %78 : vector<1x32xf32> to vector<8x32xf32>
    %80 = arith.addf %77, %79 : vector<8x32xf32>
    %c0_42 = arith.constant 0 : index
    %c0_43 = arith.constant 0 : index
    %c0_44 = arith.constant 0 : index
    %81 = vector.load %arg12[%c0_42, %c0_43, %c0_44] : memref<1x8x32xf32, #tpu.memory_space<vmem>>, vector<1x8x32xf32>
    %82 = vector.shape_cast %81 : vector<1x8x32xf32> to vector<8x32xf32>
    %83 = vector.shape_cast %80 : vector<8x32xf32> to vector<1x8x32xf32>
    tpu.vector_store %arg12[%c0_42, %c0_43, %c0_44], %83 {strides = array<i32>} : memref<1x8x32xf32, #tpu.memory_space<vmem>>, vector<1x8x32xf32>,
    return
  }
  func.func @transform_0(%arg0: i32) -> (i32, i32, i32) {
    %c0_i32 = arith.constant 0 : i32
    %c0_i32_0 = arith.constant 0 : i32
    %c0_i32_1 = arith.constant 0 : i32
    return %arg0, %c0_i32, %c0_i32_0 : i32, i32, i32
  }
  func.func @transform_1(%arg0: i32) -> (i32, i32, i32) {
    %c0_i32 = arith.constant 0 : i32
    %c0_i32_0 = arith.constant 0 : i32
    %c0_i32_1 = arith.constant 0 : i32
    return %arg0, %c0_i32, %c0_i32_0 : i32, i32, i32
  }
  func.func @transform_2(%arg0: i32) -> (i32, i32, i32) {
    %c0_i32 = arith.constant 0 : i32
    %c0_i32_0 = arith.constant 0 : i32
    %c0_i32_1 = arith.constant 0 : i32
    return %arg0, %c0_i32, %c0_i32_0 : i32, i32, i32
  }
  func.func @transform_3(%arg0: i32) -> (i32, i32) {
    %c0_i32 = arith.constant 0 : i32
    %c0_i32_0 = arith.constant 0 : i32
    %c0_i32_1 = arith.constant 0 : i32
    return %c0_i32, %c0_i32_0 : i32, i32
  }
  func.func @transform_4(%arg0: i32) -> (i32, i32) {
    %c0_i32 = arith.constant 0 : i32
    %c0_i32_0 = arith.constant 0 : i32
    %c0_i32_1 = arith.constant 0 : i32
    return %c0_i32, %c0_i32_0 : i32, i32
  }
  func.func @transform_5(%arg0: i32) -> (i32, i32) {
    %c0_i32 = arith.constant 0 : i32
    %c0_i32_0 = arith.constant 0 : i32
    %c0_i32_1 = arith.constant 0 : i32
    return %c0_i32, %c0_i32_0 : i32, i32
  }
  func.func @transform_6(%arg0: i32) -> (i32, i32) {
    %c0_i32 = arith.constant 0 : i32
    %c0_i32_0 = arith.constant 0 : i32
    %c0_i32_1 = arith.constant 0 : i32
    return %c0_i32, %c0_i32_0 : i32, i32
  }
  func.func @transform_7(%arg0: i32) -> (i32, i32) {
    %c0_i32 = arith.constant 0 : i32
    %c0_i32_0 = arith.constant 0 : i32
    %c0_i32_1 = arith.constant 0 : i32
    return %c0_i32, %c0_i32_0 : i32, i32
  }
  func.func @transform_8(%arg0: i32) -> (i32, i32) {
    %c0_i32 = arith.constant 0 : i32
    %c0_i32_0 = arith.constant 0 : i32
    %c0_i32_1 = arith.constant 0 : i32
    return %c0_i32, %c0_i32_0 : i32, i32
  }
  func.func @transform_9(%arg0: i32) -> (i32, i32) {
    %c0_i32 = arith.constant 0 : i32
    %c0_i32_0 = arith.constant 0 : i32
    %c0_i32_1 = arith.constant 0 : i32
    return %c0_i32, %c0_i32_0 : i32, i32
  }
  func.func @transform_10(%arg0: i32) -> (i32, i32) {
    %c0_i32 = arith.constant 0 : i32
    %c0_i32_0 = arith.constant 0 : i32
    %c0_i32_1 = arith.constant 0 : i32
    return %c0_i32, %c0_i32_0 : i32, i32
  }
  func.func @transform_11(%arg0: i32) -> (i32, i32, i32) {
    %c0_i32 = arith.constant 0 : i32
    %c0_i32_0 = arith.constant 0 : i32
    %c0_i32_1 = arith.constant 0 : i32
    return %arg0, %c0_i32, %c0_i32_0 : i32, i32, i32
  }
  func.func @transform_12(%arg0: i32) -> (i32, i32, i32, i32) {
    %c0_i32 = arith.constant 0 : i32
    %c0_i32_0 = arith.constant 0 : i32
    %c0_i32_1 = arith.constant 0 : i32
    %c0_i32_2 = arith.constant 0 : i32
    return %arg0, %c0_i32, %c0_i32_0, %c0_i32_1 : i32, i32, i32, i32
  }
}

</mosaic_0001>

<bundles_post_ra>
// kernel: tpu_custom_call.1
= control target key start
LH: loop header
LB: loop body
LE: loop exit
PB: predicated region body
PF: predicated region fallthrough
CT: control target
= control target key end

     0   :  { %s2105_s0 = inlined_call_operand.hbm [shape: f32[2,8,32], index: 0, kind: input, shape index: {}]   ;;  %s2106_s1 = inlined_call_operand.hbm [shape: f32[2,8,32], index: 1, kind: input, shape index: {}]   ;;  %s2107_s2 = inlined_call_operand.hbm [shape: f32[2,8,32], index: 2, kind: input, shape index: {}]   ;;  %s2108_s3 = inlined_call_operand.hbm [shape: f32[32,32], index: 3, kind: input, shape index: {}]   ;;  %s2109_s4 = inlined_call_operand.vmem [shape: f32[1,32], index: 4, kind: input, shape index: {}]   ;;  %s2110_s5 = inlined_call_operand.hbm [shape: f32[32,32], index: 5, kind: input, shape index: {}]   ;;  %s2111_s6 = inlined_call_operand.vmem [shape: f32[1,32], index: 6, kind: input, shape index: {}]   ;;  %s2112_s7 = inlined_call_operand.hbm [shape: f32[32,32], index: 7, kind: input, shape index: {}]   ;;  %s2113_s8 = inlined_call_operand.vmem [shape: f32[1,32], index: 8, kind: input, shape index: {}]   ;;  %s2114_s9 = inlined_call_operand.hbm [shape: f32[32,32], index: 9, kind: input, shape index: {}]   ;;  %s2115_s10 = inlined_call_operand.vmem [shape: f32[1,32], index: 10, kind: input, shape index: {}]   ;;  %s2116_s11 = inlined_call_operand.hbm [shape: f32[2,8,32], index: 11, kind: output, shape index: {0}]   ;;  %s2117_s12 = inlined_call_operand.hbm [shape: f32[2,4,8,8], index: 12, kind: output, shape index: {1}]  }
   0x1   :  { %2130 = sst [smem:[#allocation29_spill]] %s2106_s1 }
   0x2   :  { %2131 = sst [smem:[#allocation30_spill]] %s2108_s3 }
   0x3   :  { %2132 = sst [smem:[#allocation31_spill]] %s2110_s5 }
   0x4   :  { %2133 = sst [smem:[#allocation32_spill]] %s2112_s7 }
   0x5   :  { %2134 = sst [smem:[#allocation33_spill]] %s2114_s9 }
   0x6   :  { %2135 = sst [smem:[#allocation34_spill]] %s2115_s10 }
   0x7   :  { %2136 = sst [smem:[#allocation35_spill]] %s2116_s11 }
   0x8   :  { %18 = vsyncpa [#allocation4], 0 }
   0x9   :  { %20 = vsyncpa [#allocation4 + $0x1], 0 }
   0xa   :  { %21 = vsyncpa [#allocation7], 0 }
   0xb   :  { %23 = vsyncpa [#allocation7 + $0x1], 0 }
   0xc   :  { %24 = vsyncpa [#allocation10], 0 }
   0xd   :  { %25 = vsyncpa [#allocation13], 0 }
   0xe   :  { %26 = vsyncpa [#allocation5], 0 }
   0xf   :  { %28 = vsyncpa [#allocation5 + $0x1], 0 }
  0x10   :  { %29 = vsyncpa [#allocation17], 0 }
  0x11   :  { %31 = vsyncpa [#allocation17 + $0x1], 0  ;;  %s1793_s21 = smov 0   ;;  %s1795_s22 = smov 0  }
  0x12   :  { %s1797_s23 = smov 0   ;;  %s1799_s24 = smov 0  }
  0x13 LB: > { %2137 = sst [smem:[#allocation24_spill]] %s1701_s21  ;;  %s1817_s28 = sadd.s32 4294967295, %s1713_s24   ;;  %s1713_s24 = sphi %s1799_s24, %s2166_s24   ;;  %s1709_s23 = sphi %s1797_s23, %s2170_s23   ;;  %s1705_s22 = sphi %s1795_s22, %s2169_s22   ;;  %s1701_s21 = sphi %s1793_s21, %s2168_s21  }
  0x14   : > { %2138 = sst [smem:[#allocation25_spill]] %s1713_s24  ;;  %p1216_p0 = scmp.ge.s32.totalorder %s1713_s24, 1 }
  0x15   : > { %s2139_s3 = sld [smem:[#allocation30_spill]]  ;;  %p2128_p1 = scmp.eq.s32.totalorder %s1817_s28, 0 }
  0x16   : > { %p340_p2 = scmp.lt.s32.totalorder %s1713_s24, 3  ;;  %s1715_s30 = smov [#allocation9]  }
  0x17   : > { %s353_s13 = sshll.u32 %s1715_s30, 4  ;;  %s2141_s7 = sld [smem:[#allocation32_spill]]  ;;  %s354_s13 = int_to_ptr.vmem [resolvable:$true] %s353_s13 }
  0x18   : > { %p1822_p3 = pnand %p1216_p0, %p340_p2  ;;  %s1716_s18 = smov [#allocation12]  }
  0x19   : > { %s387_s19 = sshll.u32 %s1716_s18, 4  ;;  %s2118_s20 = smov 128   ;;  %s388_s19 = int_to_ptr.vmem [resolvable:$true] %s387_s19 }
  0x1a   : > { %p1288_p4 = pneg %p1822_p3  ;;  %s2120_s25 = smov 8  }
  0x1b   : > { %s351_s27 = sshll.u32 %s2139_s3, 4  ;;  %s1215_s26 = sadd.s32 4294967294, %s1713_s24   ;;  %s352_s27 = int_to_ptr.hbm [resolvable:$true] %s351_s27 }
  0x1c   : > { %p1834_p6 = pnand %p1288_p4, %p2128_p1  ;;  %s1850_s30 = sadd.s32 1, %s1713_s24  }
  0x1d   : > { %s385_s16 = sshll.u32 %s2141_s7, 4  ;;  %2143 = sst [smem:[#allocation26_spill]] %s1850_s30  ;;  %s386_s16 = int_to_ptr.hbm [resolvable:$true] %s385_s16 }
  0x1e   : > { %1291 = dma.hbm_to_vmem [thread:$0]  (!%p1834_p6), %s352_s27, 512, %s354_s13, [#allocation10], %s2118_s20, %s2118_s20, %s2120_s25  }
  0x1f   : > { %1297 = dma.hbm_to_vmem [thread:$0]  (!%p1834_p6), %s386_s16, 512, %s388_s19, [#allocation13], %s2118_s20, %s2118_s20, %s2120_s25  }
  0x20   : > { %s41_s14 = ssub.s32 %s1713_s24, %s1850_s30  ;;  %s44_s15 = sadd.s32 1, %s1709_s23 }
  0x21   : > { %p42_p7 = scmp.eq.s32.totalorder %s41_s14, 0  ;;  %p51_p8 = scmp.ne.s32.totalorder %s1709_s23, %s1705_s22 }
  0x22   : > { %p52_p9 = scmp.eq.s32.totalorder %s1713_s24, 0  ;;  %p57_p10 = scmp.ne.s32.totalorder %s1705_s22, %s1701_s21 }
  0x23   : > { %s1861_s27 = scalar_select %p42_p7, %s1709_s23, %s44_s15  }
  0x24   : > { %p53_p11 = por %p52_p9, %p51_p8  ;;  %p1865_p12 = por %p2128_p1, %p57_p10 }
  0x25   : > { %2144 = sst [smem:[#allocation27_spill]] %s1861_s27  ;;  %p301_p13 = scmp.eq.s32.totalorder %s1817_s28, 1 }
  0x26   : > { %p307_p0 = scmp.eq.s32.totalorder %s1215_s26, 1  ;;  %p1322_p2 = scmp.lt.s32.totalorder %s1713_s24, 2 }
  0x27   : > { %s2125_s16 = sand.u32 1, %s1709_s23   ;;  %p1872_p4 = por %p301_p13, %p51_p8 }
  0x28   : > { %p1876_p5 = por %p307_p0, %p57_p10  ;;  %s1882_s14 = sshll.u32 %s2125_s16, 3 }
  0x29   : > { %s1885_s15 = sshll.u32 %s1713_s24, 3  ;;  %p1887_p7 = pnand %p1322_p2, %p53_p11 }
  0x2a   : > { %s2147_s19 = scalar_select %p1876_p5, 1, 0 }
  0x2b   : > { %s440_s26 = sand.u32 1, %s1713_s24   ;;  %s2150_s1 = sld [smem:[#allocation29_spill]] }
  0x2c   : > { %2148 = sst [smem:[#allocation28_spill]] %s2147_s19  ;;  %s444_s30 = scalar_lea.vmem [#allocation6], %s1882_s14 }
  0x2d   : > { %s452_s19 = sshll.u32 %s444_s30, 4  ;;  %s1897_s16 = scalar_lea.sflag [#allocation7], %s440_s26  ;;  %s453_s19 = int_to_ptr.vmem [resolvable:$true] %s452_s19 }
  0x2e   : > { %p1457_p9 = pneg %p1887_p7 }
  0x31   : > { %s448_s7 = scalar_lea.hbm %s2150_s1, %s1885_s15 }
  0x32   : > { %s450_s27 = sshll.u32 %s448_s7, 4  ;;  %s1460_s7 = scalar_lea.hbm %s2150_s1, 16  ;;  %s451_s27 = int_to_ptr.hbm [resolvable:$true] %s450_s27 }
  0x33   : > { %s1453_s21 = sshra.s32 %s451_s27, 4  ;;  %s1454_s21 = int_to_ptr.hbm [resolvable:$true] %s1453_s21 }
  0x34   : > { %s1455_s10 = scalar_lea.hbm %s1454_s21, 8  ;;  %p1461_p13 = scmp.lt.s32.totalorder %s1454_s21, %s2150_s1 }
  0x35   : > { %p1456_p8 = scmp.ne.s32.totalorder %s1454_s21, %s1455_s10  ;;  %p1462_p0 = scmp.lt.s32.totalorder %s1460_s7, %s1455_s10 }
  0x37   : > { %p1458_p10 = pnand %p1457_p9, %p1456_p8  ;;  %p1463_p2 = por %p1462_p0, %p1461_p13 }
  0x39   : > { %p1459_p11 = pneg %p1458_p10 }
  0x3b   : > { %p1464_p1 = pnand %p1463_p2, %p1459_p11 }
  0x3d   : > { %1467 = shalt.err (!%p1464_p1)
}
  0x3e   : > { %1307 = dma.hbm_to_vmem [thread:$0]  (!%p1887_p7), %s451_s27, 128, %s453_s19, %s1897_s16  }
  0x3f   : > { %s2151_s5 = sld [smem:[#allocation31_spill]]  ;;  %s1719_s3 = smov [#allocation11]  }
  0x40   : > { %s370_s21 = sshll.u32 %s1719_s3, 4  ;;  %s2152_s9 = sld [smem:[#allocation33_spill]]  ;;  %s371_s21 = int_to_ptr.vmem [resolvable:$true] %s370_s21 }
  0x41   : > { %s2153_s30 = smov 8   ;;  %s2154_s1 = smov 128  }
  0x42   : > { %s1720_s27 = smov [#allocation14]   ;;  %s429_s3 = scalar_lea.hbm %s2105_s0, %s1885_s15 }
  0x43   : > { %s404_s19 = sshll.u32 %s1720_s27, 4  ;;  %s425_s10 = scalar_lea.vmem [#allocation3], %s1882_s14  ;;  %s405_s19 = int_to_ptr.vmem [resolvable:$true] %s404_s19 }
  0x44   : > { %s433_s7 = sshll.u32 %s425_s10, 4  ;;  %s434_s7 = int_to_ptr.vmem [resolvable:$true] %s433_s7 }
  0x45   : > { %s368_s24 = sshll.u32 %s2151_s5, 4  ;;  %s431_s5 = sshll.u32 %s429_s3, 4  ;;  %s369_s24 = int_to_ptr.hbm [resolvable:$true] %s368_s24  ;;  %s432_s5 = int_to_ptr.hbm [resolvable:$true] %s431_s5 }
  0x46   : > { %s402_s25 = sshll.u32 %s2152_s9, 4  ;;  %s1543_s9 = sshra.s32 %s432_s5, 4  ;;  %s403_s25 = int_to_ptr.hbm [resolvable:$true] %s402_s25  ;;  %s1544_s9 = int_to_ptr.hbm [resolvable:$true] %s1543_s9 }
  0x47   : > { %1294 = dma.hbm_to_vmem [thread:$0]  (!%p1834_p6), %s369_s24, 512, %s371_s21, [#allocation10], %s2154_s1, %s2154_s1, %s2153_s30  }
  0x48   : > { %1300 = dma.hbm_to_vmem [thread:$0]  (!%p1834_p6), %s403_s25, 512, %s405_s19, [#allocation13], %s2154_s1, %s2154_s1, %s2153_s30  }
  0x49   : > { %s2155_s24 = sand.u32 1, %s1709_s23   ;;  %s1545_s27 = scalar_lea.hbm %s1544_s9, 8 }
  0x4a   : > { %s422_s21 = scalar_lea.sflag [#allocation4], %s2155_s24  ;;  %p1546_p1 = scmp.ne.s32.totalorder %s1544_s9, %s1545_s27 }
  0x4b   : > { %s1550_s25 = scalar_lea.hbm %s2105_s0, 16  ;;  %p1551_p6 = scmp.lt.s32.totalorder %s1544_s9, %s2105_s0 }
  0x4c   : > { %p1548_p8 = pnand %p1546_p1, %p1457_p9  ;;  %p1552_p11 = scmp.lt.s32.totalorder %s1550_s25, %s1545_s27 }
  0x4e   : > { %p1549_p10 = pneg %p1548_p8  ;;  %p1553_p13 = por %p1552_p11, %p1551_p6 }
  0x50   : > { %p1554_p0 = pnand %p1553_p13, %p1549_p10 }
  0x52   : > { %1557 = shalt.err (!%p1554_p0)
}
  0x53   : > { %1304 = dma.hbm_to_vmem [thread:$0]  (!%p1887_p7), %s432_s5, 128, %s434_s7, %s422_s21  }
  0x54   : > { %s467_s3 = scalar_lea.hbm %s2107_s2, %s1885_s15  ;;  %s463_s10 = scalar_lea.vmem [#allocation8], %s1882_s14 }
  0x55   : > { %s471_s24 = sshll.u32 %s463_s10, 4  ;;  %s469_s1 = sshll.u32 %s467_s3, 4  ;;  %s472_s24 = int_to_ptr.vmem [resolvable:$true] %s471_s24  ;;  %s470_s1 = int_to_ptr.hbm [resolvable:$true] %s469_s1 }
  0x56   : > { %s1573_s9 = sshra.s32 %s470_s1, 4  ;;  %s1580_s5 = scalar_lea.hbm %s2107_s2, 16  ;;  %s1574_s9 = int_to_ptr.hbm [resolvable:$true] %s1573_s9 }
  0x57   : > { %s1575_s27 = scalar_lea.hbm %s1574_s9, 8  ;;  %p1581_p10 = scmp.lt.s32.totalorder %s1574_s9, %s2107_s2 }
  0x58   : > { %p1576_p2 = scmp.ne.s32.totalorder %s1574_s9, %s1575_s27  ;;  %p1582_p6 = scmp.lt.s32.totalorder %s1580_s5, %s1575_s27 }
  0x5a   : > { %p1578_p1 = pnand %p1576_p2, %p1457_p9  ;;  %p1583_p11 = por %p1582_p6, %p1581_p10 }
  0x5c   : > { %p1579_p8 = pneg %p1578_p1 }
  0x5e   : > { %p1584_p13 = pnand %p1583_p11, %p1579_p8 }
  0x60   : > { %1587 = shalt.err (!%p1584_p13)
}
  0x61   : > { %1310 = dma.hbm_to_vmem [thread:$0]  (!%p1887_p7), %s470_s1, 128, %s472_s24, %s1897_s16  }
  0x62   : > { %480 = sbr.rel (%p1822_p3) target bundleno = 1170 (0x492), region = 64  ;;  %s1967_s14 = sand.u32 (!%p1822_p3), 1, %s1705_s22  }
  0x63   : > { %s1970_s15 = sshll.u32 (!%p1822_p3), %s1967_s14, 3  ;;  %s483_s30 = scalar_lea.sflag (!%p1822_p3), [#allocation4], %s1967_s14 }
  0x64   : > { %s486_s19 = scalar_lea.vmem (!%p1822_p3), [#allocation3], %s1970_s15 }
  0x67   : > { %1676 = dma.done.wait (%p1865_p12), %s483_s30, 128  }
  0x68   : > { %1678 = vsyncadd (%p1865_p12), %s483_s30, 4294967168  ;;  %s492_s29 = sand.u32 1, %s1817_s28   ;;  %s496_s16 = scalar_lea.vmem [#allocation6], %s1970_s15 }
  0x69   : > { %s493_s20 = scalar_lea.sflag [#allocation7], %s492_s29 }
  0x6a   : > { %1680 = dma.done.wait (%p1865_p12), %s493_s20, 256  }
  0x6b   : > { %1682 = vsyncadd (%p1865_p12), %s493_s20, 4294967040  ;;  %s506_s11 = scalar_lea.vmem [#allocation8], %s1970_s15  ;;  %p2156_p3 = scmp.eq.s32.totalorder %s1817_s28, 0 }
  0x6d   : > { %1684 = dma.done.wait (%p2156_p3), [#allocation10], 1024   ;;  %p2157_p7 = pmov %p2156_p3 }
  0x6e   : > { %p2158_p9 = pmov %p2156_p3 }
  0x6f   : > { %1686 = vsyncadd (%p2157_p7), [#allocation10], 4294966272 }
  0x70   : > { %1688 = dma.done.wait (%p2158_p9), [#allocation13], 1024   ;;  %p2159_p0 = pmov %p2156_p3 }
  0x71   : > { %v589_v0 = vld [vmem:[#allocation9 + $0x18] sm:$0xff]  ;;  %v588_v2 = vld [vmem:[#allocation9 + $0x10] sm:$0xff]  ;;  %v587_v4 = vld [vmem:[#allocation9 + $0x8] sm:$0xff]  ;;  %vm594_vm0 = vcmask 261120   ;;  %vm704_vm1 = vcmask 64512   ;;  %s1721_s24 = smov 112  }
  0x72   : > { %1690 = vsyncadd (%p2159_p0), [#allocation13], 4294966272  ;;  %v621_v1 = vld [vmem:[#allocation11 + $0x18] sm:$0xff]  ;;  %610 = vmatpush.msra.mxu0 %v589_v0  ;;  %v620_v3 = vld [vmem:[#allocation11 + $0x10] sm:$0xff]  ;;  %s1722_s1 = smov 120   ;;  %s1723_s9 = smov 104  }
  0x73   : > { %641 = vmatpush.msra.mxu1 %v621_v1  ;;  %v619_v5 = vld [vmem:[#allocation11 + $0x8] sm:$0xff]  ;;  %v586_v6 = vld [vmem:[#allocation9] sm:$0xff]  ;;  %v583_v8 = vld [vmem:[%s486_s19] sm:$0xff]  ;;  %s1237_s25 = sshll.u32 %s1967_s14, 5  ;;  %s1724_s7 = smov 16   ;;  %vm946_vm2 = vcmask 130112  }
  0x74   : > { %611 = vmatpush.msra.mxu0 %v588_v2  ;;  %v618_v7 = vld [vmem:[#allocation11] sm:$0xff]  ;;  %v1373_v10 = vld [vmem:[%s2109_s4] ss:$0 sm:$0xff]  ;;  %v652_v22 = vld [vmem:[#allocation12 + $0x18] sm:$0xff]  ;;  %s2033_s5 = scalar_lea.vmem [#allocation16], %s1237_s25  ;;  %s1725_s21 = smov 8  }
  0x75   : > { %642 = vmatpush.msra.mxu1 %v620_v3  ;;  %v584_v9 = vld [vmem:[%s496_s16] sm:$0xff]  ;;  %v651_v23 = vld [vmem:[#allocation12 + $0x10] sm:$0xff]  ;;  %672 = vmatpush.msra.mxu2 %v652_v22  ;;  %s1726_s30 = smov 24   ;;  %vm952_vm3 = vcmask 195712   ;;  %vm958_vm4 = vcmask 261312   ;;  %s1261_s19 = sshll.u32 %s1817_s28, 5 }
  0x76   : > { %612 = vmatpush.msra.mxu0 %v587_v4  ;;  %v1374_v11 = vld [vmem:[%s2111_s6] ss:$0 sm:$0xff]  ;;  %v649_v25 = vld [vmem:[#allocation12] sm:$0xff]  ;;  %v585_v26 = vld [vmem:[%s506_s11] sm:$0xff]  ;;  %s1024_s16 = scalar_lea.hbm %s2117_s12, %s1261_s19  ;;  %s1025_s11 = sshll.u32 %s2033_s5, 4  ;;  %s1026_s11 = int_to_ptr.vmem [resolvable:$true] %s1025_s11 }
  0x77   : > { %643 = vmatpush.msra.mxu1 %v619_v5  ;;  %v650_v24 = vld [vmem:[#allocation12 + $0x8] sm:$0xff]  ;;  %673 = vmatpush.msra.mxu2 %v651_v23  ;;  %s1027_s13 = sshll.u32 %s1024_s16, 4  ;;  %s999_s26 = scalar_lea.sflag [#allocation17], %s1967_s14  ;;  %s1028_s13 = int_to_ptr.hbm [resolvable:$true] %s1027_s13 }
  0x78   : > { %613 = vmatpush.msra.mxu0 %v586_v6  ;;  %v1375_v36 = vld [vmem:[%s2113_s8] ss:$0 sm:$0xff]  ;;  %s1617_s3 = sshra.s32 %s1028_s13, 4  ;;  %s1618_s3 = int_to_ptr.hbm [resolvable:$true] %s1617_s3 }
  0x79   : > { %644 = vmatpush.msra.mxu1 %v618_v7  ;;  %1238 = vmatmul.msk.f32.vlgmr.msra.gmra.mxu0 %vm594_vm0, %v583_v8  ;;  %s1619_s10 = scalar_lea.hbm %s1618_s3, 32  ;;  %p1624_p8 = scmp.lt.s32.totalorder %s1618_s3, %s2117_s12 }
  0x7a   : > { %1239 = vmatmul.msk.f32.vlgmr.msra.gmra.mxu1 %vm594_vm0, %v584_v9  ;;  %674 = vmatpush.msra.mxu2 %v650_v24  ;;  %p1620_p12 = scmp.ne.s32.totalorder %s1618_s3, %s1619_s10 }
  0x7c   : > { %675 = vmatpush.msra.mxu2 %v649_v25  ;;  %p1621_p2 = pnand %p1620_p12, %p1872_p4 }
  0x7d   : > { %1240 = vmatmul.msk.f32.vlgmr.msra.gmra.mxu2 %vm594_vm0, %v585_v26 }
  0x7e   : > { %p1622_p1 = pneg %p1621_p2 }
  0xf6   : > { %v615_v12 = vpop.f32.mrf.mxu0 }
  0xf7   : > { %v646_v13 = vpop.f32.mrf.mxu1  ;;  %v616_v14 = vadd.f32 %v1373_v10, %v615_v12 }
  0xf8   : > { %v647_v15 = vadd.f32 %v1374_v11, %v646_v13  ;;  %v964_v13 = vld [vmem:[#allocation14 + $0x18] sm:$0xff] }
  0xf9   : > { %683 = vrot.lane.b32.xlu2 %v616_v14, %s1721_s24 }
  0xfa   : > { %690 = vrot.lane.b32.xlu1 %v647_v15, %s1721_s24  ;;  %688 = vrot.lane.b32.xlu0 %v647_v15, %s1722_s1 }
  0xfb   : > { %1241 = vmatpush.xpose.msk.msra.mxu3 %vm704_vm1, %v647_v15 }
  0xfe   : > { %1242 = vmatmul.msk.f32.vlgmr.msra.gmra.mxu3 %vm704_vm1, %v616_v14 }
 0x100   : > { %v677_v39 = vpop.f32.mrf.mxu2 }
 0x101   : > { %685 = vrot.lane.b32.xlu2 %v616_v14, %s1723_s9  ;;  %v678_v40 = vadd.f32 %v1375_v36, %v677_v39 }
 0x102   : > { %692 = vrot.lane.b32.xlu1 %v647_v15, %s1723_s9  ;;  %681 = vrot.lane.b32.xlu0 %v616_v14, %s1722_s1  ;;  %v963_v14 = vld [vmem:[#allocation14 + $0x10] sm:$0xff]  ;;  %v962_v15 = vld [vmem:[#allocation14 + $0x8] sm:$0xff] }
 0x103   : > { %867 = vmatpush.msrb.mxu2 %v678_v40 }
 0x105   : > { %984 = vmatpush.msra.mxu2 %v964_v13 }
 0x107   : > { %985 = vmatpush.msra.mxu2 %v963_v14 }
 0x109   : > { %986 = vmatpush.msra.mxu2 %v962_v15 }
 0x153   : > { %v684_v18 = vpop.permute.xlu2 %683 }
 0x15b   : > { %v686_v21 = vpop.permute.xlu2 %685 }
 0x16c   : > { %v691_v16 = vpop.permute.xlu1 %690  ;;  %v689_v17 = vpop.permute.xlu0 %688 }
 0x16d   : > { %1243 = vmatpush.xpose.msk.msrb.mxu3 %vm704_vm1, %v689_v17  ;;  %1245 = vmatpush.xpose.msk.msrb.mxu0 %vm704_vm1, %v691_v16  ;;  %v961_v16 = vld [vmem:[#allocation14] sm:$0xff] }
 0x16e   : > { %987 = vmatpush.msra.mxu2 %v961_v16 }
 0x170   : > { %1246 = vmatmul.msk.f32.vlgmr.msrb.gmra.mxu0 %vm704_vm1, %v684_v18 }
 0x174   : > { %v693_v19 = vpop.permute.xlu1 %692  ;;  %v682_v20 = vpop.permute.xlu0 %681 }
 0x175   : > { %1244 = vmatmul.msk.f32.vlgmr.msrb.gmra.mxu3 %vm704_vm1, %v682_v20  ;;  %1247 = vmatpush.xpose.msk.msrb.mxu1 %vm704_vm1, %v693_v19 }
 0x178   : > { %1248 = vmatmul.msk.f32.vlgmr.msrb.gmra.mxu1 %vm704_vm1, %v686_v21 }
 0x181   : > { %v726_v29 = vpop.f32.mrf.mxu3 }
 0x182   : > { %v801_v34 = vsel %vm704_vm1, %v726_v29, -inf }
 0x1ed   : > { %v774_v27 = vpop.f32.mrf.mxu0 }
 0x1ee   : > { %v807_v28 = vsel %vm704_vm1, %v774_v27, -inf }
 0x1ef   : > { %808 = vmax.xlane.f32.xlu1 %v807_v28 }
 0x1f5   : > { %v798_v30 = vpop.f32.mrf.mxu1 }
 0x1f6   : > { %v810_v31 = vsel %vm704_vm1, %v798_v30, -inf }
 0x1f7   : > { %811 = vmax.xlane.f32.xlu2 %v810_v31 }
 0x1f8   : > { %v750_v32 = vpop.f32.mrf.mxu3 }
 0x1f9   : > { %v804_v33 = vsel %vm704_vm1, %v750_v32, -inf }
 0x1fa   : > { %805 = vmax.xlane.f32.xlu0 %v804_v33 }
 0x1ff   : > { %802 = vmax.xlane.f32.xlu2 %v801_v34 }
 0x262   : > { %v809_v35 = vpop.xlane.xlu1 %808 }
 0x263   : > { %v815_v37 = vsub.f32 %v774_v27, %v809_v35 }
 0x265   : > { %v821_v38 = vmul.f32 1.442695, %v815_v37 }
 0x267   : > { %1377 = vpow2.f32 %v821_v38 }
 0x26a   : > { %v812_v41 = vpop.xlane.xlu2 %811 }
 0x26b   : > { %v816_v42 = vsub.f32 %v798_v30, %v812_v41 }
 0x26d   : > { %v1378_v43 = vpop.eup %1377  ;;  %v823_v44 = vmul.f32 1.442695, %v816_v42  ;;  %v806_v45 = vpop.xlane.xlu0 %805 }
 0x26e   : > { %v814_v46 = vsub.f32 %v750_v32, %v806_v45  ;;  %v831_v47 = vsel %vm704_vm1, %v1378_v43, 0.0 }
 0x26f   : > { %1379 = vpow2.f32 %v823_v44  ;;  %832 = vadd.xlane.f32.xlu1 %v831_v47 }
 0x270   : > { %v819_v48 = vmul.f32 1.442695, %v814_v46 }
 0x272   : > { %1381 = vpow2.f32 %v819_v48  ;;  %v803_v53 = vpop.xlane.xlu2 %802 }
 0x273   : > { %v813_v54 = vsub.f32 %v726_v29, %v803_v53 }
 0x275   : > { %v1380_v49 = vpop.eup %1379  ;;  %v817_v55 = vmul.f32 1.442695, %v813_v54 }
 0x276   : > { %v834_v50 = vsel %vm704_vm1, %v1380_v49, 0.0 }
 0x277   : > { %835 = vadd.xlane.f32.xlu2 %v834_v50  ;;  %1383 = vpow2.f32 %v817_v55 }
 0x278   : > { %v1382_v51 = vpop.eup %1381 }
 0x279   : > { %v828_v52 = vsel %vm704_vm1, %v1382_v51, 0.0 }
 0x27a   : > { %829 = vadd.xlane.f32.xlu0 %v828_v52 }
 0x27d   : > { %v1384_v56 = vpop.eup %1383 }
 0x27e   : > { %v825_v57 = vsel %vm704_vm1, %v1384_v56, 0.0 }
 0x288   : > { %698 = vrot.lane.b32.xlu1 %v678_v40, %s1721_s24 }
 0x28e   : > { %695 = vrot.lane.b32.xlu0 %v678_v40, %s1722_s1 }
 0x28f   : > { %701 = vrot.lane.b32.xlu2 %v678_v40, %s1723_s9  ;;  %s1623_s9 = scalar_lea.hbm %s2117_s12, 64 }
 0x290   : > { %p1625_p10 = scmp.lt.s32.totalorder %s1623_s9, %s1619_s10 }
 0x292   : > { %p1626_p6 = por %p1625_p10, %p1624_p8 }
 0x294   : > { %p1627_p11 = pnand %p1626_p6, %p1622_p1 }
 0x2b8   : > { %826 = vadd.xlane.f32.xlu0 %v825_v57 }
 0x2e2   : > { %v833_v58 = vpop.xlane.xlu1 %832 }
 0x2e3   : > { %1385 = vrcp.f32 %v833_v58 }
 0x2e9   : > { %v1386_v59 = vpop.eup %1385 }
 0x2ea   : > { %v843_v60 = vmul.f32 %v1386_v59, %v1378_v43  ;;  %v836_v61 = vpop.xlane.xlu2 %835 }
 0x2eb   : > { %1387 = vrcp.f32 %v836_v61 }
 0x2ec   : > { %847 = vst.msk [vmem:[%s2033_s5 + $0x10] sm:$0xff] %vm704_vm1, %v843_v60 }
 0x2ed   : > { %v830_v62 = vpop.xlane.xlu0 %829 }
 0x2ee   : > { %1389 = vrcp.f32 %v830_v62 }
 0x2f1   : > { %v1388_v63 = vpop.eup %1387 }
 0x2f2   : > { %v844_v0 = vmul.f32 %v1388_v63, %v1380_v49  ;;  %v702_v1 = vpop.permute.xlu2 %701 }
 0x2f3   : > { %936 = vmatpush.msra.mxu1 %v702_v1 }
 0x2f4   : > { %v1390_v2 = vpop.eup %1389  ;;  %848 = vst.msk [vmem:[%s2033_s5 + $0x18] sm:$0xff] %vm704_vm1, %v844_v0  ;;  %1252 = vmatmul.msk.f32.vlgmr.msra.gmra.mxu1 %vm704_vm1, %v844_v0 }
 0x2f5   : > { %v842_v3 = vmul.f32 %v1390_v2, %v1382_v51 }
 0x2f7   : > { %846 = vst.msk [vmem:[%s2033_s5 + $0x8] sm:$0xff] %vm704_vm1, %v842_v3 }
 0x2fa   : > { %v699_v4 = vpop.permute.xlu1 %698 }
 0x2fb   : > { %913 = vmatpush.msra.mxu0 %v699_v4 }
 0x2fc   : > { %1251 = vmatmul.msk.f32.vlgmr.msra.gmra.mxu0 %vm704_vm1, %v843_v60 }
 0x300   : > { %v696_v5 = vpop.permute.xlu0 %695 }
 0x301   : > { %890 = vmatpush.msra.mxu3 %v696_v5 }
 0x302   : > { %1250 = vmatmul.msk.f32.vlgmr.msra.gmra.mxu3 %vm704_vm1, %v842_v3 }
 0x32b   : > { %v827_v6 = vpop.xlane.xlu0 %826 }
 0x32c   : > { %1391 = vrcp.f32 %v827_v6 }
 0x332   : > { %v1392_v7 = vpop.eup %1391 }
 0x333   : > { %v841_v8 = vmul.f32 %v1392_v7, %v1384_v56 }
 0x335   : > { %845 = vst.msk [vmem:[%s2033_s5] sm:$0xff] %vm704_vm1, %v841_v8  ;;  %1249 = vmatmul.msk.f32.vlgmr.msrb.gmra.mxu2 %vm704_vm1, %v841_v8 }
 0x371   : > { %v938_v11 = vpop.f32.mrf.mxu1 }
 0x379   : > { %v915_v9 = vpop.f32.mrf.mxu0 }
 0x37a   : > { %949 = vrot.lane.b32.xlu2 %v915_v9, %s1724_s7 }
 0x385   : > { %v892_v10 = vpop.f32.mrf.mxu3 }
 0x386   : > { %943 = vrot.lane.b32.xlu1 %v892_v10, %s1725_s21 }
 0x38e   : > { %955 = vrot.lane.b32.xlu1 %v938_v11, %s1726_s30 }
 0x3b8   : > { %v869_v12 = vpop.f32.mrf.mxu2 }
 0x3b9   : > { %941 = vst.msk [vmem:[#allocation2] sm:$0xff] %vm704_vm1, %v869_v12 }
 0x3d4   : > { %v950_v18 = vpop.permute.xlu2 %949 }
 0x3f8   : > { %v944_v17 = vpop.permute.xlu1 %943 }
 0x3f9   : > { %947 = vst.msk [vmem:[#allocation2] sm:$0xff] %vm946_vm2, %v944_v17 }
 0x3fa   : > { %953 = vst.msk [vmem:[#allocation2] sm:$0xff] %vm952_vm3, %v950_v18 }
 0x400   : > { %v956_v19 = vpop.permute.xlu1 %955 }
 0x401   : > { %959 = vst.msk [vmem:[#allocation2] sm:$0xff] %vm958_vm4, %v956_v19 }
 0x408   : > { %v960_v20 = vld [vmem:[#allocation2] sm:$0xff] }
 0x409   : > { %1253 = vmatmul.msk.f32.vlgmr.msra.gmra.mxu2 %vm594_vm0, %v960_v20 }
 0x40a   : > { %1630 = shalt.err (!%p1627_p11)
}
 0x40b   : > { %s1727_s25 = smov 128   ;;  %s1256_s5 = sshll.u32 %s1817_s28, 3 }
 0x40c   : > { %1285 = dma.vmem_to_hbm [thread:$0]  (%p1872_p4), %s1026_s11, 512, %s1028_s13, %s999_s26, %s1727_s25, %s1727_s25, %s1725_s21  }
 0x40d   : > { %s2160_s19 = sld [smem:[#allocation35_spill]]  ;;  %s575_s10 = scalar_lea.vmem [#allocation15], %s1970_s15 }
 0x40e   : > { %s2161_s3 = sld [smem:[#allocation34_spill]]  ;;  %s1011_s24 = sshll.u32 %s575_s10, 4  ;;  %s1012_s24 = int_to_ptr.vmem [resolvable:$true] %s1011_s24 }
 0x40f   : > { %s994_s21 = scalar_lea.sflag [#allocation5], %s1967_s14 }
 0x413   : > { %s1009_s29 = scalar_lea.hbm %s2160_s19, %s1256_s5  ;;  %s1651_s15 = scalar_lea.hbm %s2160_s19, 16 }
 0x414   : > { %v1376_v21 = vld [vmem:[%s2161_s3] ss:$0 sm:$0xff]  ;;  %s1013_s1 = sshll.u32 %s1009_s29, 4  ;;  %s1014_s1 = int_to_ptr.hbm [resolvable:$true] %s1013_s1 }
 0x415   : > { %s1645_s28 = sshra.s32 %s1014_s1, 4  ;;  %s1646_s28 = int_to_ptr.hbm [resolvable:$true] %s1645_s28 }
 0x416   : > { %s1647_s11 = scalar_lea.hbm %s1646_s28, 8  ;;  %p1652_p9 = scmp.lt.s32.totalorder %s1646_s28, %s2160_s19 }
 0x417   : > { %p1648_p13 = scmp.ne.s32.totalorder %s1646_s28, %s1647_s11  ;;  %p1653_p0 = scmp.lt.s32.totalorder %s1651_s15, %s1647_s11 }
 0x419   : > { %p1649_p3 = pnand %p1648_p13, %p1872_p4  ;;  %p1654_p12 = por %p1653_p0, %p1652_p9 }
 0x41b   : > { %p1650_p7 = pneg %p1649_p3 }
 0x41d   : > { %p1655_p2 = pnand %p1654_p12, %p1650_p7 }
 0x48c   : > { %v989_v22 = vpop.f32.mrf.mxu2 }
 0x48d   : > { %v990_v23 = vadd.f32 %v1376_v21, %v989_v22 }
 0x48f   : > { %992 = vst.msk [vmem:[%s575_s10] sm:$0xff] %vm594_vm0, %v990_v23 }
 0x490   : > { %1658 = shalt.err (!%p1655_p2)
}
 0x491   : > { %1284 = dma.vmem_to_hbm [thread:$0]  (%p1872_p4), %s1012_s24, 128, %s1014_s1, %s994_s21  }
 0x492 PF: > { %s2162_s14 = sld [smem:[#allocation24_spill]] }
 0x493   : > { %s2164_s25 = sld [smem:[#allocation25_spill]] }
 0x498   : > { %s1042_s5 = sand.u32 1, %s2162_s14  }
 0x499   : > { %p2165_p1 = scmp.ge.s32.totalorder %s2164_s25, 2  ;;  %s1043_s7 = scalar_lea.sflag [#allocation5], %s1042_s5 }
 0x49b   : > { %p1312_p8 = pnand %p2165_p1, %p1876_p5 }
 0x49d   : > { %p1313_p10 = pneg %p1312_p8 }
 0x49f   : > { %1692 = dma.done.wait (%p1313_p10), %s1043_s7, 128  }
 0x4a0   : > { %1694 = vsyncadd (%p1313_p10), %s1043_s7, 4294967168  ;;  %s1053_s30 = scalar_lea.sflag [#allocation17], %s1042_s5 }
 0x4a1   : > { %1696 = dma.done.wait (%p1313_p10), %s1053_s30, 512  }
 0x4a2   : > { %1698 = vsyncadd (%p1313_p10), %s1053_s30, 4294966784  ;;  %s2166_s24 = sld [smem:[#allocation26_spill]]  ;;  %s2168_s21 = smov %s1705_s22 }
 0x4a3   : > { %s2167_s18 = sld [smem:[#allocation27_spill]]  ;;  %s2169_s22 = smov %s1709_s23 }
 0x4a8   : > { %p34_p4 = scmp.ge.s32.totalorder %s2166_s24, 4  }
 0x4a9   : > { %s2170_s23 = smov %s2167_s18 }
 0x4aa   :  { %36 = sbr.rel (!%p34_p4) target bundleno = 19 (0x13), region = 166 }
 0x4af   :  { %1059 = vsyncpa [#allocation4], 1 }
 0x4b0   :  { %1061 = vsyncpa [#allocation4 + $0x1], 1 }
 0x4b1   :  { %1062 = vsyncpa [#allocation7], 1 }
 0x4b2   :  { %1064 = vsyncpa [#allocation7 + $0x1], 1 }
 0x4b3   :  { %1065 = vsyncpa [#allocation10], 1 }
 0x4b4   :  { %1066 = vsyncpa [#allocation13], 1 }
 0x4b5   :  { %1067 = vsyncpa [#allocation5], 1 }
 0x4b6   :  { %1069 = vsyncpa [#allocation5 + $0x1], 1 }
 0x4b7   :  { %1070 = vsyncpa [#allocation17], 1 }
 0x4b8   :  { %1072 = vsyncpa [#allocation17 + $0x1], 1 }

</bundles_post_ra>
